<compile_context>
chip_gen: v6e
topology: v6e:2x2x1
jax: 0.10.0
libtpu: 0.0.40
codegen_flags: <defaults>
</compile_context>

<pallas_src>
import functools

import jax
import jax.numpy as jnp
from jax import lax
from jax.experimental import pallas as pl
from jax.experimental.pallas import tpu as pltpu


# ---------------------------------------------------------------------------
# Pallas kernel
# ---------------------------------------------------------------------------
def temporal_block_kernel(x_ref, w1_ref, t1_ref, w2_ref, t2_ref,
                          wd_ref, s3_ref, t3_ref, out_ref,
                          x_buf, h1_buf, *,
                          kernel_size, dilation, padding, time_tile):
    f32 = jnp.float32
    TL = time_tile
    t = pl.program_id(1)

    # ---- carry the causal history (last `padding` columns of the previous
    #      time tile) in persistent VMEM scratch; zero it on the first tile ----
    @pl.when(t == 0)
    def _():
        x_buf[:, :padding] = jnp.zeros((x_buf.shape[0], padding), x_buf.dtype)
        h1_buf[:, :padding] = jnp.zeros((h1_buf.shape[0], padding), h1_buf.dtype)

    @pl.when(t > 0)
    def _():
        x_buf[:, :padding] = x_buf[:, TL:TL + padding]
        h1_buf[:, :padding] = h1_buf[:, TL:TL + padding]

    # new input time tile goes after the history prefix
    x_buf[:, padding:] = x_ref[...]

    # ---- conv1 (+ bias + BN1 folded) + ReLU : one im2col matmul ----
    xb = x_buf[...]                                            # (C_in, pad+TL)
    taps1 = jnp.concatenate(
        [xb[:, k * dilation:k * dilation + TL] for k in range(kernel_size)],
        axis=0)                                                # (K*C_in, TL)
    h1 = jnp.dot(w1_ref[...], taps1, preferred_element_type=f32) + t1_ref[...]
    h1 = jnp.maximum(h1, 0.0)
    # dropout1: identity in eval mode
    h1_buf[:, padding:] = h1.astype(h1_buf.dtype)

    # ---- conv2 (+ bias + BN2 folded) + ReLU ----
    hb = h1_buf[...]                                           # (C_out, pad+TL)
    taps2 = jnp.concatenate(
        [hb[:, k * dilation:k * dilation + TL] for k in range(kernel_size)],
        axis=0)                                                # (K*C_out, TL)
    h2 = jnp.dot(w2_ref[...], taps2, preferred_element_type=f32) + t2_ref[...]
    h2 = jnp.maximum(h2, 0.0)
    # dropout2: identity in eval mode

    # ---- residual (1x1 conv, BN3 scale folded into wd) + BN3 + ReLU ----
    res = jnp.dot(wd_ref[...], x_ref[...], preferred_element_type=f32)
    out = h2 * s3_ref[...] + res + t3_ref[...]
    out_ref[...] = jnp.maximum(out, 0.0).astype(out_ref.dtype)


# ---------------------------------------------------------------------------
# Host-side wrapper
# ---------------------------------------------------------------------------
def temporal_block_pallas(x, folded, *, kernel_size, dilation, padding,
                          time_tile=None, compute_dtype=jnp.float32):
    """x: (N, C_in, L) float32. Returns (N, C_out, L) float32."""
    N, C_in, L = x.shape
    C_out = folded["t1"].shape[0]

    # the causal left-pad-only / chomp formulation requires this relation
    if padding != (kernel_size - 1) * dilation or padding < 1:
        raise ValueError("requires padding == (kernel_size - 1) * dilation >= 1")

    if time_tile is None:
        for cand in (512, 256, 128):
            if L % cand == 0:
                time_tile = cand
                break
        else:
            time_tile = L          # tiny problems: single (lane-padded) tile
    TL = time_tile
    if L % TL != 0:
        raise ValueError("L must be a multiple of the time tile")
    if TL < padding:
        raise ValueError("time tile must be >= padding")
    n_t = L // TL

    x = x.astype(compute_dtype)

    def full_spec(a):
        nd = a.ndim
        return pl.BlockSpec(a.shape, lambda n, t: (0,) * nd)

    grid_spec = pltpu.PrefetchScalarGridSpec(
        num_scalar_prefetch=0,
        grid=(N, n_t),
        in_specs=[
            pl.BlockSpec((None, C_in, TL), lambda n, t: (n, 0, t)),   # x tile
            full_spec(folded["w1"]),                                  # (C_out, K*C_in)
            full_spec(folded["t1"]),                                  # (C_out, 1)
            full_spec(folded["w2"]),                                  # (C_out, K*C_out)
            full_spec(folded["t2"]),                                  # (C_out, 1)
            full_spec(folded["wd"]),                                  # (C_out, C_in)
            full_spec(folded["s3"]),                                  # (C_out, 1)
            full_spec(folded["t3"]),                                  # (C_out, 1)
        ],
        out_specs=pl.BlockSpec((None, C_out, TL), lambda n, t: (n, 0, t)),
        scratch_shapes=[
            pltpu.VMEM((C_in, padding + TL), compute_dtype),    # x history + tile
            pltpu.VMEM((C_out, padding + TL), compute_dtype),   # h1 history + tile
        ],
    )

    kernel = functools.partial(temporal_block_kernel,
                               kernel_size=kernel_size,
                               dilation=dilation,
                               padding=padding,
                               time_tile=TL)

    return pl.pallas_call(
        kernel,
        grid_spec=grid_spec,
        out_shape=jax.ShapeDtypeStruct((N, C_out, L), jnp.float32),
        compiler_params=pltpu.CompilerParams(
            dimension_semantics=("parallel", "arbitrary")),
    )(x, folded["w1"], folded["t1"], folded["w2"], folded["t2"],
      folded["wd"], folded["s3"], folded["t3"])


# ---------------------------------------------------------------------------
# Parameter folding (bias + inference BatchNorm into weights / shifts)
# ---------------------------------------------------------------------------
def fold_kernel_params(p, *, eps=1e-5, compute_dtype=jnp.float32):
    C_out, C_in, K = p["w1"].shape

    def affine(stats):
        gamma, beta, mean, var = stats
        s = gamma / jnp.sqrt(var + eps)
        return s, beta - mean * s

    s1, t1 = affine(p["bn1"])
    s2, t2 = affine(p["bn2"])
    s3, t3 = affine(p["bn3"])

    def im2col_weight(w, s):
        # (C_out, C, K) scaled per out-channel -> (C_out, K*C); column index is
        # k*C + c, matching the tap stacking order inside the kernel.
        wf = w * s[:, None, None]
        return jnp.transpose(wf, (0, 2, 1)).reshape(w.shape[0], -1)

    if p["wd"] is not None:
        wd2, bd = p["wd"][:, :, 0], p["bd"]
    else:                                   # n_inputs == n_outputs: identity residual
        wd2 = jnp.eye(C_out, dtype=jnp.float32)
        bd = jnp.zeros((C_out,), jnp.float32)

    return {
        "w1": im2col_weight(p["w1"], s1).astype(compute_dtype),
        "t1": (s1 * p["b1"] + t1).reshape(C_out, 1).astype(jnp.float32),
        "w2": im2col_weight(p["w2"], s2).astype(compute_dtype),
        "t2": (s2 * p["b2"] + t2).reshape(C_out, 1).astype(jnp.float32),
        "wd": (wd2 * s3[:, None]).astype(compute_dtype),
        "s3": s3.reshape(C_out, 1).astype(jnp.float32),
        "t3": (s3 * bd + t3).reshape(C_out, 1).astype(jnp.float32),
    }


# ---------------------------------------------------------------------------
# Pure-JAX reference (follows the PyTorch module literally) for verification.
# ---------------------------------------------------------------------------
def _conv1d_nch(x, w, b, *, padding, dilation):
    # x: (N, C_in, L), w: (C_out, C_in, K)  (torch OIH layout)
    y = lax.conv_general_dilated(
        x, w, window_strides=(1,), padding=[(padding, padding)],
        rhs_dilation=(dilation,), dimension_numbers=("NCH", "OIH", "NCH"))
    return y + b[None, :, None]


def temporal_block_ref(x, p, *, dilation, padding, eps=1e-5):
    def bn(y, stats):
        gamma, beta, mean, var = stats
        return ((y - mean[None, :, None]) / jnp.sqrt(var[None, :, None] + eps)
                * gamma[None, :, None] + beta[None, :, None])

    h = _conv1d_nch(x, p["w1"], p["b1"], padding=padding, dilation=dilation)
    h = h[:, :, :-padding]                          # Chomp1d
    h = jnp.maximum(bn(h, p["bn1"]), 0.0)           # bn1 + relu1 (+ dropout id)
    h = _conv1d_nch(h, p["w2"], p["b2"], padding=padding, dilation=dilation)
    h = h[:, :, :-padding]                          # Chomp1d
    h = jnp.maximum(bn(h, p["bn2"]), 0.0)           # bn2 + relu2 (+ dropout id)
    if p["wd"] is not None:
        res = _conv1d_nch(x, p["wd"], p["bd"], padding=0, dilation=1)
    else:
        res = x
    out = h + res                                   # (MTHA treated as identity)
    return jnp.maximum(bn(out, p["bn3"]), 0.0)      # bn3 + relu


def _weight_norm(v, g):
    # v: (C_out, C_in, K), g: (C_out,)  -> g * v / ||v|| (per output channel)
    nrm = jnp.sqrt(jnp.sum(v.reshape(v.shape[0], -1) ** 2, axis=1))
    return g[:, None, None] * v / nrm[:, None, None]


if __name__ == "__main__":
    # Small shapes consistent with Conv1d(n_inputs, n_outputs, kernel_size, ...);
    # L chosen as a multiple of 128 so the lane-dense time tiling is exercised.
    N, C_in, C_out, L = 2, 8, 16, 512
    K, dilation = 3, 2
    padding = (K - 1) * dilation                # standard causal TCN padding
    eps = 1e-5

    key = jax.random.PRNGKey(0)
    ks = jax.random.split(key, 12)

    x = jax.random.normal(ks[0], (N, C_in, L), jnp.float32)

    # conv1 / conv2: weight_norm(Conv1d) with v ~ N(0, 0.01), free gain g
    v1 = 0.01 * jax.random.normal(ks[1], (C_out, C_in, K), jnp.float32)
    g1 = 1.0 + 0.1 * jax.random.normal(ks[2], (C_out,), jnp.float32)
    w1 = _weight_norm(v1, g1)
    b1 = 0.1 * jax.random.normal(ks[3], (C_out,), jnp.float32)

    v2 = 0.01 * jax.random.normal(ks[4], (C_out, C_out, K), jnp.float32)
    g2 = 1.0 + 0.1 * jax.random.normal(ks[5], (C_out,), jnp.float32)
    w2 = _weight_norm(v2, g2)
    b2 = 0.1 * jax.random.normal(ks[6], (C_out,), jnp.float32)

    # downsample 1x1 conv (exists because C_in != C_out)
    wd = 0.01 * jax.random.normal(ks[7], (C_out, C_in, 1), jnp.float32)
    bd = 0.1 * jax.random.normal(ks[8], (C_out,), jnp.float32)

    # BatchNorm running stats / affine (inference); random to exercise folding
    def bn_stats(k):
        ka, kb, kc, kd = jax.random.split(k, 4)
        gamma = 1.0 + 0.1 * jax.random.normal(ka, (C_out,), jnp.float32)
        beta = 0.1 * jax.random.normal(kb, (C_out,), jnp.float32)
        mean = 0.1 * jax.random.normal(kc, (C_out,), jnp.float32)
        var = jax.random.uniform(kd, (C_out,), jnp.float32, 0.5, 1.5)
        return gamma, beta, mean, var

    params = {
        "w1": w1, "b1": b1, "w2": w2, "b2": b2, "wd": wd, "bd": bd,
        "bn1": bn_stats(ks[9]),
        "bn2": bn_stats(ks[10]),
        "bn3": bn_stats(ks[11]),
    }

    ref = jax.block_until_ready(
        temporal_block_ref(x, params, dilation=dilation, padding=padding, eps=eps))

    # ---- float32 path (default; v5e-friendly f32 epilogue everywhere) ----
    folded_f32 = fold_kernel_params(params, eps=eps, compute_dtype=jnp.float32)
    out = temporal_block_pallas(x, folded_f32, kernel_size=K, dilation=dilation,
                                padding=padding, compute_dtype=jnp.float32)
    out = jax.block_until_ready(out)
    assert out.shape == (N, C_out, L)
    assert jnp.allclose(out, ref, atol=1e-4, rtol=1e-4), (
        float(jnp.max(jnp.abs(out - ref))))

    # ---- bf16 MXU-input path (v6e/v7x): bf16 operands, f32 acc + f32 epilogue ----
    folded_bf16 = fold_kernel_params(params, eps=eps, compute_dtype=jnp.bfloat16)
    out_bf16 = temporal_block_pallas(x, folded_bf16, kernel_size=K, dilation=dilation,
                                     padding=padding, compute_dtype=jnp.bfloat16)
    out_bf16 = jax.block_until_ready(out_bf16)
    assert jnp.allclose(out_bf16, ref, atol=2e-2, rtol=2e-2), (
        float(jnp.max(jnp.abs(out_bf16 - ref))))

    print("KERNEL_OK")
</pallas_src>

<mosaic_0001>
module attributes {stable_mosaic.version = 11 : i64} {
  func.func @temporal_block_kernel(%arg0: i32, %arg1: i32, %arg2: memref<1x8x512xf32, #tpu.memory_space<vmem>>, %arg3: memref<16x24xf32, #tpu.memory_space<vmem>>, %arg4: memref<16x1xf32, #tpu.memory_space<vmem>>, %arg5: memref<16x48xf32, #tpu.memory_space<vmem>>, %arg6: memref<16x1xf32, #tpu.memory_space<vmem>>, %arg7: memref<16x8xf32, #tpu.memory_space<vmem>>, %arg8: memref<16x1xf32, #tpu.memory_space<vmem>>, %arg9: memref<16x1xf32, #tpu.memory_space<vmem>>, %arg10: memref<1x16x512xf32, #tpu.memory_space<vmem>>, %arg11: memref<8x516xf32, #tpu.memory_space<vmem>>, %arg12: memref<16x516xf32, #tpu.memory_space<vmem>>) attributes {dimension_semantics = [#tpu.dimension_semantics<parallel>, #tpu.dimension_semantics<arbitrary>], iteration_bounds = array<i64: 2, 1>, scalar_prefetch = 0 : i64, scratch_operands = 2 : i64, tpu.core_type = #tpu.core_type<tc>, window_params = [{transform_indices = @transform_0, window_bounds = array<i64: 1, 8, 512>}, {pipeline_mode = #tpu.pipeline_mode<synchronous>, transform_indices = @transform_1, window_bounds = array<i64: 16, 24>}, {pipeline_mode = #tpu.pipeline_mode<synchronous>, transform_indices = @transform_2, window_bounds = array<i64: 16, 1>}, {pipeline_mode = #tpu.pipeline_mode<synchronous>, transform_indices = @transform_3, window_bounds = array<i64: 16, 48>}, {pipeline_mode = #tpu.pipeline_mode<synchronous>, transform_indices = @transform_4, window_bounds = array<i64: 16, 1>}, {pipeline_mode = #tpu.pipeline_mode<synchronous>, transform_indices = @transform_5, window_bounds = array<i64: 16, 8>}, {pipeline_mode = #tpu.pipeline_mode<synchronous>, transform_indices = @transform_6, window_bounds = array<i64: 16, 1>}, {pipeline_mode = #tpu.pipeline_mode<synchronous>, transform_indices = @transform_7, window_bounds = array<i64: 16, 1>}, {transform_indices = @transform_8, window_bounds = array<i64: 1, 16, 512>}]} {
    %c0_i32 = arith.constant 0 : i32
    %0 = arith.cmpi eq, %arg1, %c0_i32 : i32
    %1 = arith.extui %0 : i1 to i32
    %c0_i32_0 = arith.constant 0 : i32
    %2 = arith.cmpi ne, %1, %c0_i32_0 : i32
    scf.if %2 {
      %cst_37 = arith.constant 0.000000e+00 : f32
      %50 = vector.broadcast %cst_37 : f32 to vector<8x4xf32>
      %c0_38 = arith.constant 0 : index
      %c0_39 = arith.constant 0 : index
      %51 = vector.load %arg11[%c0_38, %c0_39] : memref<8x516xf32, #tpu.memory_space<vmem>>, vector<8x4xf32>
      tpu.vector_store %arg11[%c0_38, %c0_39], %50 {strides = array<i32>} : memref<8x516xf32, #tpu.memory_space<vmem>>, vector<8x4xf32>,
      %cst_40 = arith.constant 0.000000e+00 : f32
      %52 = vector.broadcast %cst_40 : f32 to vector<16x4xf32>
      %c0_41 = arith.constant 0 : index
      %c0_42 = arith.constant 0 : index
      %53 = vector.load %arg12[%c0_41, %c0_42] : memref<16x516xf32, #tpu.memory_space<vmem>>, vector<16x4xf32>
      tpu.vector_store %arg12[%c0_41, %c0_42], %52 {strides = array<i32>} : memref<16x516xf32, #tpu.memory_space<vmem>>, vector<16x4xf32>,
    } else {
    }
    %c0_i32_1 = arith.constant 0 : i32
    %3 = arith.cmpi sgt, %arg1, %c0_i32_1 : i32
    %4 = arith.extui %3 : i1 to i32
    %c0_i32_2 = arith.constant 0 : i32
    %5 = arith.cmpi ne, %4, %c0_i32_2 : i32
    scf.if %5 {
      %c0_37 = arith.constant 0 : index
      %c512 = arith.constant 512 : index
      %50 = vector.load %arg11[%c0_37, %c512] : memref<8x516xf32, #tpu.memory_space<vmem>>, vector<8x4xf32>
      %c0_38 = arith.constant 0 : index
      %c0_39 = arith.constant 0 : index
      %51 = vector.load %arg11[%c0_38, %c0_39] : memref<8x516xf32, #tpu.memory_space<vmem>>, vector<8x4xf32>
      tpu.vector_store %arg11[%c0_38, %c0_39], %50 {strides = array<i32>} : memref<8x516xf32, #tpu.memory_space<vmem>>, vector<8x4xf32>,
      %c0_40 = arith.constant 0 : index
      %c512_41 = arith.constant 512 : index
      %52 = vector.load %arg12[%c0_40, %c512_41] : memref<16x516xf32, #tpu.memory_space<vmem>>, vector<16x4xf32>
      %c0_42 = arith.constant 0 : index
      %c0_43 = arith.constant 0 : index
      %53 = vector.load %arg12[%c0_42, %c0_43] : memref<16x516xf32, #tpu.memory_space<vmem>>, vector<16x4xf32>
      tpu.vector_store %arg12[%c0_42, %c0_43], %52 {strides = array<i32>} : memref<16x516xf32, #tpu.memory_space<vmem>>, vector<16x4xf32>,
    } else {
    }
    %c0 = arith.constant 0 : index
    %c0_3 = arith.constant 0 : index
    %c0_4 = arith.constant 0 : index
    %6 = vector.load %arg2[%c0, %c0_3, %c0_4] : memref<1x8x512xf32, #tpu.memory_space<vmem>>, vector<1x8x512xf32>
    %7 = vector.shape_cast %6 : vector<1x8x512xf32> to vector<8x512xf32>
    %c0_5 = arith.constant 0 : index
    %c4 = arith.constant 4 : index
    %8 = vector.load %arg11[%c0_5, %c4] : memref<8x516xf32, #tpu.memory_space<vmem>>, vector<8x512xf32>
    tpu.vector_store %arg11[%c0_5, %c4], %7 {strides = array<i32>} : memref<8x516xf32, #tpu.memory_space<vmem>>, vector<8x512xf32>,
    %c0_6 = arith.constant 0 : index
    %c0_7 = arith.constant 0 : index
    %9 = vector.load %arg11[%c0_6, %c0_7] : memref<8x516xf32, #tpu.memory_space<vmem>>, vector<8x516xf32>
    %10 = vector.extract_strided_slice %9 {offsets = [0, 0], sizes = [8, 512], strides = [1, 1]} : vector<8x516xf32> to vector<8x512xf32>
    %11 = vector.extract_strided_slice %9 {offsets = [0, 2], sizes = [8, 512], strides = [1, 1]} : vector<8x516xf32> to vector<8x512xf32>
    %12 = vector.extract_strided_slice %9 {offsets = [0, 4], sizes = [8, 512], strides = [1, 1]} : vector<8x516xf32> to vector<8x512xf32>
    %13 = tpu.concatenate %10, %11, %12 in 0 : vector<8x512xf32>, vector<8x512xf32>, vector<8x512xf32> -> vector<24x512xf32>
    %c0_8 = arith.constant 0 : index
    %c0_9 = arith.constant 0 : index
    %14 = vector.load %arg3[%c0_8, %c0_9] : memref<16x24xf32, #tpu.memory_space<vmem>>, vector<16x24xf32>
    %cst = arith.constant dense<0.000000e+00> : vector<16x512xf32>
    %15 = tpu.matmul %14, %13, %cst {dimension_numbers = #tpu.dot_dimension_numbers<[1], [0], [0], [1], [0, 0, 1, 1], [], []>} : vector<16x24xf32>, vector<24x512xf32>, vector<16x512xf32> -> vector<16x512xf32>
    %c0_10 = arith.constant 0 : index
    %c0_11 = arith.constant 0 : index
    %16 = vector.load %arg4[%c0_10, %c0_11] : memref<16x1xf32, #tpu.memory_space<vmem>>, vector<16x1xf32>
    %17 = vector.broadcast %16 : vector<16x1xf32> to vector<16x512xf32>
    %18 = arith.addf %15, %17 : vector<16x512xf32>
    %cst_12 = arith.constant 0.000000e+00 : f32
    %19 = vector.broadcast %cst_12 : f32 to vector<16x512xf32>
    %20 = arith.maximumf %18, %19 : vector<16x512xf32>
    %c0_13 = arith.constant 0 : index
    %c4_14 = arith.constant 4 : index
    %21 = vector.load %arg12[%c0_13, %c4_14] : memref<16x516xf32, #tpu.memory_space<vmem>>, vector<16x512xf32>
    tpu.vector_store %arg12[%c0_13, %c4_14], %20 {strides = array<i32>} : memref<16x516xf32, #tpu.memory_space<vmem>>, vector<16x512xf32>,
    %c0_15 = arith.constant 0 : index
    %c0_16 = arith.constant 0 : index
    %22 = vector.load %arg12[%c0_15, %c0_16] : memref<16x516xf32, #tpu.memory_space<vmem>>, vector<16x516xf32>
    %23 = vector.extract_strided_slice %22 {offsets = [0, 0], sizes = [16, 512], strides = [1, 1]} : vector<16x516xf32> to vector<16x512xf32>
    %24 = vector.extract_strided_slice %22 {offsets = [0, 2], sizes = [16, 512], strides = [1, 1]} : vector<16x516xf32> to vector<16x512xf32>
    %25 = vector.extract_strided_slice %22 {offsets = [0, 4], sizes = [16, 512], strides = [1, 1]} : vector<16x516xf32> to vector<16x512xf32>
    %26 = tpu.concatenate %23, %24, %25 in 0 : vector<16x512xf32>, vector<16x512xf32>, vector<16x512xf32> -> vector<48x512xf32>
    %c0_17 = arith.constant 0 : index
    %c0_18 = arith.constant 0 : index
    %27 = vector.load %arg5[%c0_17, %c0_18] : memref<16x48xf32, #tpu.memory_space<vmem>>, vector<16x48xf32>
    %cst_19 = arith.constant dense<0.000000e+00> : vector<16x512xf32>
    %28 = tpu.matmul %27, %26, %cst_19 {dimension_numbers = #tpu.dot_dimension_numbers<[1], [0], [0], [1], [0, 0, 1, 1], [], []>} : vector<16x48xf32>, vector<48x512xf32>, vector<16x512xf32> -> vector<16x512xf32>
    %c0_20 = arith.constant 0 : index
    %c0_21 = arith.constant 0 : index
    %29 = vector.load %arg6[%c0_20, %c0_21] : memref<16x1xf32, #tpu.memory_space<vmem>>, vector<16x1xf32>
    %30 = vector.broadcast %29 : vector<16x1xf32> to vector<16x512xf32>
    %31 = arith.addf %28, %30 : vector<16x512xf32>
    %cst_22 = arith.constant 0.000000e+00 : f32
    %32 = vector.broadcast %cst_22 : f32 to vector<16x512xf32>
    %33 = arith.maximumf %31, %32 : vector<16x512xf32>
    %c0_23 = arith.constant 0 : index
    %c0_24 = arith.constant 0 : index
    %34 = vector.load %arg7[%c0_23, %c0_24] : memref<16x8xf32, #tpu.memory_space<vmem>>, vector<16x8xf32>
    %c0_25 = arith.constant 0 : index
    %c0_26 = arith.constant 0 : index
    %c0_27 = arith.constant 0 : index
    %35 = vector.load %arg2[%c0_25, %c0_26, %c0_27] : memref<1x8x512xf32, #tpu.memory_space<vmem>>, vector<1x8x512xf32>
    %36 = vector.shape_cast %35 : vector<1x8x512xf32> to vector<8x512xf32>
    %cst_28 = arith.constant dense<0.000000e+00> : vector<16x512xf32>
    %37 = tpu.matmul %34, %36, %cst_28 {dimension_numbers = #tpu.dot_dimension_numbers<[1], [0], [0], [1], [0, 0, 1, 1], [], []>} : vector<16x8xf32>, vector<8x512xf32>, vector<16x512xf32> -> vector<16x512xf32>
    %c0_29 = arith.constant 0 : index
    %c0_30 = arith.constant 0 : index
    %38 = vector.load %arg8[%c0_29, %c0_30] : memref<16x1xf32, #tpu.memory_space<vmem>>, vector<16x1xf32>
    %39 = vector.broadcast %38 : vector<16x1xf32> to vector<16x512xf32>
    %40 = arith.mulf %33, %39 : vector<16x512xf32>
    %41 = arith.addf %40, %37 : vector<16x512xf32>
    %c0_31 = arith.constant 0 : index
    %c0_32 = arith.constant 0 : index
    %42 = vector.load %arg9[%c0_31, %c0_32] : memref<16x1xf32, #tpu.memory_space<vmem>>, vector<16x1xf32>
    %43 = vector.broadcast %42 : vector<16x1xf32> to vector<16x512xf32>
    %44 = arith.addf %41, %43 : vector<16x512xf32>
    %cst_33 = arith.constant 0.000000e+00 : f32
    %45 = vector.broadcast %cst_33 : f32 to vector<16x512xf32>
    %46 = arith.maximumf %44, %45 : vector<16x512xf32>
    %c0_34 = arith.constant 0 : index
    %c0_35 = arith.constant 0 : index
    %c0_36 = arith.constant 0 : index
    %47 = vector.load %arg10[%c0_34, %c0_35, %c0_36] : memref<1x16x512xf32, #tpu.memory_space<vmem>>, vector<1x16x512xf32>
    %48 = vector.shape_cast %47 : vector<1x16x512xf32> to vector<16x512xf32>
    %49 = vector.shape_cast %46 : vector<16x512xf32> to vector<1x16x512xf32>
    tpu.vector_store %arg10[%c0_34, %c0_35, %c0_36], %49 {strides = array<i32>} : memref<1x16x512xf32, #tpu.memory_space<vmem>>, vector<1x16x512xf32>,
    return
  }
  func.func @transform_0(%arg0: i32, %arg1: i32) -> (i32, i32, i32) {
    %c0_i32 = arith.constant 0 : i32
    %c0_i32_0 = arith.constant 0 : i32
    return %arg0, %c0_i32, %arg1 : i32, i32, i32
  }
  func.func @transform_1(%arg0: i32, %arg1: i32) -> (i32, i32) {
    %c0_i32 = arith.constant 0 : i32
    %c0_i32_0 = arith.constant 0 : i32
    %c0_i32_1 = arith.constant 0 : i32
    return %c0_i32, %c0_i32_0 : i32, i32
  }
  func.func @transform_2(%arg0: i32, %arg1: i32) -> (i32, i32) {
    %c0_i32 = arith.constant 0 : i32
    %c0_i32_0 = arith.constant 0 : i32
    %c0_i32_1 = arith.constant 0 : i32
    return %c0_i32, %c0_i32_0 : i32, i32
  }
  func.func @transform_3(%arg0: i32, %arg1: i32) -> (i32, i32) {
    %c0_i32 = arith.constant 0 : i32
    %c0_i32_0 = arith.constant 0 : i32
    %c0_i32_1 = arith.constant 0 : i32
    return %c0_i32, %c0_i32_0 : i32, i32
  }
  func.func @transform_4(%arg0: i32, %arg1: i32) -> (i32, i32) {
    %c0_i32 = arith.constant 0 : i32
    %c0_i32_0 = arith.constant 0 : i32
    %c0_i32_1 = arith.constant 0 : i32
    return %c0_i32, %c0_i32_0 : i32, i32
  }
  func.func @transform_5(%arg0: i32, %arg1: i32) -> (i32, i32) {
    %c0_i32 = arith.constant 0 : i32
    %c0_i32_0 = arith.constant 0 : i32
    %c0_i32_1 = arith.constant 0 : i32
    return %c0_i32, %c0_i32_0 : i32, i32
  }
  func.func @transform_6(%arg0: i32, %arg1: i32) -> (i32, i32) {
    %c0_i32 = arith.constant 0 : i32
    %c0_i32_0 = arith.constant 0 : i32
    %c0_i32_1 = arith.constant 0 : i32
    return %c0_i32, %c0_i32_0 : i32, i32
  }
  func.func @transform_7(%arg0: i32, %arg1: i32) -> (i32, i32) {
    %c0_i32 = arith.constant 0 : i32
    %c0_i32_0 = arith.constant 0 : i32
    %c0_i32_1 = arith.constant 0 : i32
    return %c0_i32, %c0_i32_0 : i32, i32
  }
  func.func @transform_8(%arg0: i32, %arg1: i32) -> (i32, i32, i32) {
    %c0_i32 = arith.constant 0 : i32
    %c0_i32_0 = arith.constant 0 : i32
    return %arg0, %c0_i32, %arg1 : i32, i32, i32
  }
}

</mosaic_0001>

<bundles_post_ra>
// kernel: tpu_custom_call.1
= control target key start
LH: loop header
LB: loop body
LE: loop exit
PB: predicated region body
PF: predicated region fallthrough
CT: control target
= control target key end

     0   :  { %13 = vsyncpa [#allocation5], 0  ;;  %s1819_s0 = inlined_call_operand.vmem [shape: f32[2,8,512], index: 0, kind: input, shape index: {}]   ;;  %s1820_s1 = inlined_call_operand.vmem [shape: f32[16,24], index: 1, kind: input, shape index: {}]   ;;  %s1821_s2 = inlined_call_operand.vmem [shape: f32[16,1], index: 2, kind: input, shape index: {}]   ;;  %s1822_s3 = inlined_call_operand.vmem [shape: f32[16,48], index: 3, kind: input, shape index: {}]   ;;  %s1823_s4 = inlined_call_operand.vmem [shape: f32[16,1], index: 4, kind: input, shape index: {}]   ;;  %s1824_s5 = inlined_call_operand.vmem [shape: f32[16,8], index: 5, kind: input, shape index: {}]   ;;  %s1825_s6 = inlined_call_operand.vmem [shape: f32[16,1], index: 6, kind: input, shape index: {}]   ;;  %s1826_s7 = inlined_call_operand.vmem [shape: f32[16,1], index: 7, kind: input, shape index: {}]   ;;  %s1827_s8 = inlined_call_operand.hbm [shape: f32[2,16,512], index: 8, kind: output, shape index: {}]  }
   0x1   :  { %15 = vsyncpa [#allocation5 + $0x1], 0  ;;  %s1489_s27 = smov 0   ;;  %s1491_s28 = smov 0  }
   0x2   :  { %s1493_s29 = smov 0   ;;  %s1495_s30 = smov 0  }
   0x3   :  { %s1497_s9 = smov 0   ;;  %s1499_s10 = smov 0  }
   0x4 LB: > { %s1267_s11 = sadd.s32 4294967295, %s1434_s10   ;;  %s1268_s12 = sadd.s32 4294967294, %s1434_s10   ;;  %s1434_s10 = sphi %s1499_s10, %s21_s10   ;;  %s1430_s9 = sphi %s1497_s9, %s1834_s9   ;;  %s1426_s30 = sphi %s1495_s30, %s1833_s30   ;;  %s1422_s29 = sphi %s1493_s29, %s1832_s29   ;;  %s1418_s28 = sphi %s1491_s28, %s1831_s28   ;;  %s1414_s27 = sphi %s1489_s27, %s1830_s27  }
   0x5   : > { %s33_s13 = sadd.s32 1, %s1430_s9  ;;  %s217_s14 = sadd.s32 1, %s1422_s29 }
   0x6   : > { %p35_p0 = scmp.ge.s32.totalorder %s33_s13, 2  ;;  %p227_p1 = scmp.ne.s32.totalorder %s1422_s29, %s1418_s28 }
   0x7   : > { %p228_p2 = scmp.eq.s32.totalorder %s1267_s11, 1  ;;  %p233_p3 = scmp.ne.s32.totalorder %s1418_s28, %s1414_s27 }
   0x8   : > { %s1836_s13 = smov (%p35_p0, %s33_s13), 0  ;;  %p234_p5 = scmp.eq.s32.totalorder %s1268_s12, 1 }
   0x9   : > { %p1529_p4 = por %p228_p2, %p227_p1  ;;  %s212_s16 = ssub.s32 %s1430_s9, %s1836_s13 }
   0xa   : > { %p1271_p6 = scmp.ge.s32.totalorder %s1434_s10, 1  ;;  %p215_p7 = scmp.eq.s32.totalorder %s212_s16, 0 }
   0xb   : > { %p1536_p8 = por %p234_p5, %p233_p3  ;;  %p286_p9 = scmp.lt.s32.totalorder %s1434_s10, 3 }
   0xc   : > { %s1542_s18 = scalar_select %p215_p7, %s1422_s29, %s217_s14  }
   0xd   : > { %p287_p10 = pnand %p1271_p6, %p286_p9 }
   0xe   : > { %p325_p11 = scmp.lt.s32.totalorder (!%p287_p10), %s1426_s30, 1  ;;  %s1437_s24 = smov (!%p287_p10), 4  }
   0xf   : > { %290 = sbr.rel (%p287_p10) target bundleno = 1006 (0x3ee), region = 52  ;;  %s1438_s25 = smov (!%p287_p10), 124  }
  0x10   : > { %s1439_s26 = smov (!%p287_p10), 126   ;;  %s1441_s16 = smov (!%p287_p10), [#allocation4]  }
  0x14   : > { %vm339_vm0 = vcmask 31744   ;;  %v1436_v0 = vmov 0.0   ;;  %s326_s19 = scalar_select %p325_p11, %s1426_s30, 1  ;;  %vm379_vm1 = vcmask 1047584   ;;  %v1440_v14 = vmov 0   ;;  %v436_v15 = vld [vmem:[%s1821_s2 + $0x8] sm:$0xff] }
  0x15   : > { %340 = vst.msk [vmem:[#allocation2] sm:$0xff] %vm339_vm0, %v1436_v0  ;;  %341 = vst.msk [vmem:[#allocation3] sm:$0xff] %vm339_vm0, %v1436_v0  ;;  %518 = vmatprep.mubr.f32.mxu0 %v1436_v0  ;;  %595 = vmatprep.mubr.f32.mxu1 %v1436_v0  ;;  %v435_v16 = vld [vmem:[%s1821_s2] sm:$0xff]  ;;  %vm424_vm2 = vcmask 1014784   ;;  %vm405_vm3 = vcmask 1031168   ;;  %vm447_vm4 = vcmask 195584  }
  0x16   : > { %342 = vst.msk [vmem:[#allocation3 + $0x28] sm:$0xff] %vm339_vm0, %v1436_v0  ;;  %s1292_s20 = sshll.u32 %s326_s19, 5  ;;  %1357 = vset.pattern.permute.xlu1 %v1440_v14  ;;  %1356 = vset.pattern.permute.xlu0 %v1440_v14  ;;  %v433_v33 = vld [vmem:[%s1820_s1] sm:$0xff]  ;;  %v434_v36 = vld [vmem:[%s1820_s1 + $0x8] sm:$0xff]  ;;  %vm772_vm5 = vcmask 392192   ;;  %vm947_vm6 = vcmask 64512  }
  0x17   : > { %s332_s23 = scalar_lea.vmem %s1819_s0, %s1292_s20  ;;  %s321_s20 = sand.u32 1, %s1418_s28  }
  0x18   : > { %v1557_v1 = vld [vmem:[%s332_s23 + $0x10] sm:$0xff]  ;;  %v1559_v2 = vld [vmem:[%s332_s23] sm:$0xff]  ;;  %v1565_v3 = vld [vmem:[%s332_s23 + $0x18] sm:$0xff]  ;;  %s1272_s21 = sshll.u32 %s321_s20, 6  ;;  %s1774_s14 = scalar_lea.sflag [#allocation5], %s321_s20 }
  0x19   : > { %366 = vrot.lane.b32.xlu1 %v1557_v1, %s1437_s24  ;;  %362 = vrot.lane.b32.xlu0 %v1559_v2, %s1437_s24  ;;  %v1567_v4 = vld [vmem:[%s332_s23 + $0x8] sm:$0xff]  ;;  %s1753_s22 = scalar_lea.vmem [#allocation4], %s1272_s21  ;;  %s1293_s23 = sshll.u32 %s1426_s30, 10 }
  0x1a   : > { %s1766_s12 = scalar_lea.hbm %s1827_s8, %s1293_s23 }
  0x1d   : > { %368 = vrot.lane.b32.xlu1 %v1565_v3, %s1437_s24  ;;  %364 = vrot.lane.b32.xlu0 %v1567_v4, %s1437_s24 }
  0x8b   : > { %v367_v5 = vpop.permute.xlu1 %366  ;;  %v363_v6 = vpop.permute.xlu0 %362 }
  0x8c   : > { %380 = vst.msk [vmem:[#allocation2] sm:$0xff] %vm379_vm1, %v363_v6 }
  0x8f   : > { %v369_v7 = vpop.permute.xlu1 %368  ;;  %v365_v8 = vpop.permute.xlu0 %364 }
  0x90   : > { %v373_v9 = vsel %vm339_vm0, %v367_v5, %v369_v7  ;;  %384 = vst.msk [vmem:[#allocation2 + $0x20] sm:$0xff] %vm339_vm0, %v369_v7  ;;  %v371_v10 = vsel %vm339_vm0, %v363_v6, %v365_v8  ;;  %v372_v11 = vsel %vm339_vm0, %v365_v8, %v367_v5 }
  0x93   : > { %v385_v12 = vld [vmem:[#allocation2] sm:$0xff] }
  0x94   : > { %414 = vrot.lane.b32.xlu0 %v385_v12, %s1438_s25 }
  0x97   : > { %v389_v13 = vld [vmem:[#allocation2 + $0x20] sm:$0xff] }
  0x98   : > { %422 = vrot.lane.b32.xlu1 %v389_v13, %s1438_s25  ;;  %416 = vrot.lane.b32.xlu0 %v371_v10, %s1438_s25 }
  0x9c   : > { %418 = vrot.lane.b32.xlu1 %v372_v11, %s1438_s25  ;;  %420 = vrot.lane.b32.xlu0 %v373_v9, %s1438_s25 }
  0xa0   : > { %397 = vrot.lane.b32.xlu1 %v371_v10, %s1439_s26  ;;  %399 = vrot.lane.b32.xlu0 %v372_v11, %s1439_s26 }
  0xa4   : > { %401 = vrot.lane.b32.xlu1 %v373_v9, %s1439_s26  ;;  %403 = vrot.lane.b32.xlu0 %v389_v13, %s1439_s26 }
  0xa8   : > { %395 = vrot.lane.b32.xlu1 %v385_v12, %s1439_s26  ;;  %444 = vperm.xlu0 %1356, %v436_v15  }
  0xac   : > { %439 = vperm.xlu1 %1357, %v435_v16  }
 0x106   : > { %v415_v17 = vpop.permute.xlu0 %414 }
 0x10a   : > { %v423_v18 = vpop.permute.xlu1 %422  ;;  %v417_v19 = vpop.permute.xlu0 %416 }
 0x10b   : > { %v425_v25 = vsel %vm424_vm2, %v415_v17, %v417_v19 }
 0x10e   : > { %v419_v20 = vpop.permute.xlu1 %418  ;;  %v421_v21 = vpop.permute.xlu0 %420 }
 0x10f   : > { %v426_v22 = vsel %vm424_vm2, %v417_v19, %v419_v20  ;;  %v428_v23 = vsel %vm424_vm2, %v421_v21, %v423_v18  ;;  %v427_v24 = vsel %vm424_vm2, %v419_v20, %v421_v21 }
 0x110   : > { %480 = vmatprep.subr.mxu0 %v426_v22  ;;  %557 = vmatprep.subr.mxu1 %v428_v23  ;;  %v761_v22 = vld [vmem:[%s1823_s4 + $0x8] sm:$0xff] }
 0x111   : > { %481 = vmatpush1.msra.mxu0 %v425_v25  ;;  %558 = vmatpush1.msra.mxu1 %v427_v24  ;;  %v1109_v23 = vld [vmem:[%s1825_s6 + $0x8] sm:$0xff]  ;;  %v760_v25 = vld [vmem:[%s1823_s4] sm:$0xff] }
 0x112   : > { %v398_v26 = vpop.permute.xlu1 %397  ;;  %v400_v27 = vpop.permute.xlu0 %399  ;;  %v1137_v24 = vld [vmem:[%s1826_s7 + $0x8] sm:$0xff] }
 0x113   : > { %v407_v28 = vsel %vm405_vm3, %v398_v26, %v400_v27 }
 0x114   : > { %482 = vmatprep.subr.mxu0 %v407_v28 }
 0x116   : > { %v402_v29 = vpop.permute.xlu1 %401  ;;  %v404_v30 = vpop.permute.xlu0 %403 }
 0x117   : > { %v409_v31 = vsel %vm405_vm3, %v402_v29, %v404_v30  ;;  %v408_v32 = vsel %vm405_vm3, %v400_v27, %v402_v29  ;;  %v1136_v27 = vld [vmem:[%s1826_s7] sm:$0xff] }
 0x118   : > { %559 = vmatprep.subr.mxu1 %v409_v31 }
 0x119   : > { %560 = vmatpush1.msra.mxu1 %v408_v32 }
 0x11a   : > { %v396_v34 = vpop.permute.xlu1 %395  ;;  %561 = vmatprep.subr.mxu1 %v373_v9 }
 0x11b   : > { %v406_v35 = vsel %vm405_vm3, %v396_v34, %v398_v26  ;;  %562 = vmatpush1.msra.mxu1 %v372_v11  ;;  %v1108_v26 = vld [vmem:[%s1825_s6] sm:$0xff] }
 0x11c   : > { %483 = vmatpush1.msra.mxu0 %v406_v35  ;;  %1277 = vmatmul.mubr.msk.f32.vlgmr.msra.gmra.mxu1 %vm447_vm4, %v433_v33 }
 0x11d   : > { %484 = vmatprep.subr.mxu0 %v371_v10  ;;  %601 = vmatprep.mubr.f32.mxu1 %v1436_v0 }
 0x11e   : > { %485 = vmatpush1.msra.mxu0 %v385_v12 }
 0x11f   : > { %1275 = vmatmul.mubr.msk.f32.vlgmr.msra.gmra.mxu0 %vm447_vm4, %v433_v33 }
 0x120   : > { %524 = vmatprep.mubr.f32.mxu0 %v1436_v0  ;;  %1278 = vmatmul.mubr.msk.f32.gmra.mxu1 %vm447_vm4, %v434_v36 }
 0x121   : > { %920 = vmatprep.mubr.f32.mxu1 %v1436_v0 }
 0x123   : > { %1276 = vmatmul.mubr.msk.f32.gmra.mxu0 %vm447_vm4, %v434_v36  ;;  %v445_v42 = vpop.permute.xlu0 %444 }
 0x124   : > { %843 = vmatprep.mubr.f32.mxu0 %v1436_v0 }
 0x127   : > { %v440_v38 = vpop.permute.xlu1 %439 }
 0x1dc   : > { %v597_v37 = vpop.f32.mrf.mxu1 }
 0x1dd   : > { %v598_v57 = vadd.f32 %v597_v37, %v440_v38 }
 0x1de   : > { %v599_v39 = vpop.f32.mrf.mxu1 }
 0x1df   : > { %v520_v40 = vpop.f32.mrf.mxu0  ;;  %v600_v59 = vadd.f32 %v599_v39, %v440_v38  ;;  %v610_v61 = vmax.f32 %v598_v57, 0.0 }
 0x1e0   : > { %v521_v41 = vadd.f32 %v520_v40, %v440_v38  ;;  %v603_v44 = vpop.f32.mrf.mxu1 }
 0x1e1   : > { %v522_v43 = vpop.f32.mrf.mxu0  ;;  %v604_v54 = vadd.f32 %v603_v44, %v445_v42  ;;  %v611_v62 = vmax.f32 %v600_v59, 0.0 }
 0x1e2   : > { %v608_v45 = vmax.f32 %v521_v41, 0.0  ;;  %v523_v46 = vadd.f32 %v522_v43, %v440_v38  ;;  %v605_v51 = vpop.f32.mrf.mxu1 }
 0x1e3   : > { %v526_v47 = vpop.f32.mrf.mxu0  ;;  %v606_v56 = vadd.f32 %v605_v51, %v445_v42  ;;  %v614_v58 = vmax.f32 %v604_v54, 0.0 }
 0x1e4   : > { %v609_v48 = vmax.f32 %v523_v46, 0.0  ;;  %624 = vrot.lane.b32.xlu1 %v608_v45, %s1437_s24  ;;  %v527_v49 = vadd.f32 %v526_v47, %v445_v42 }
 0x1e5   : > { %v528_v50 = vpop.f32.mrf.mxu0  ;;  %v615_v60 = vmax.f32 %v606_v56, 0.0 }
 0x1e6   : > { %v529_v52 = vadd.f32 %v528_v50, %v445_v42  ;;  %626 = vrot.lane.b32.xlu0 %v609_v48, %s1437_s24  ;;  %v612_v53 = vmax.f32 %v527_v49, 0.0 }
 0x1e8   : > { %v613_v55 = vmax.f32 %v529_v52, 0.0  ;;  %632 = vrot.lane.b32.xlu1 %v612_v53, %s1437_s24 }
 0x1ea   : > { %634 = vrot.lane.b32.xlu0 %v613_v55, %s1437_s24 }
 0x1ec   : > { %636 = vrot.lane.b32.xlu1 %v614_v58, %s1437_s24 }
 0x1ee   : > { %638 = vrot.lane.b32.xlu0 %v615_v60, %s1437_s24 }
 0x1f0   : > { %628 = vrot.lane.b32.xlu1 %v610_v61, %s1437_s24  ;;  %v758_v61 = vld [vmem:[%s1822_s3] sm:$0xff] }
 0x1f2   : > { %630 = vrot.lane.b32.xlu0 %v611_v62, %s1437_s24 }
 0x256   : > { %v625_v63 = vpop.permute.xlu1 %624 }
 0x257   : > { %656 = vst.msk [vmem:[#allocation3] sm:$0xff] %vm379_vm1, %v625_v63 }
 0x258   : > { %v627_v5 = vpop.permute.xlu0 %626 }
 0x259   : > { %v1622_v6 = vsel %vm339_vm0, %v625_v63, %v627_v5 }
 0x25a   : > { %v633_v7 = vpop.permute.xlu1 %632 }
 0x25b   : > { %661 = vst.msk [vmem:[#allocation3 + $0x28] sm:$0xff] %vm379_vm1, %v633_v7 }
 0x25c   : > { %v635_v8 = vpop.permute.xlu0 %634 }
 0x25d   : > { %v1626_v9 = vsel %vm339_vm0, %v633_v7, %v635_v8  ;;  %v759_v7 = vld [vmem:[%s1822_s3 + $0x8] sm:$0xff] }
 0x25e   : > { %v637_v10 = vpop.permute.xlu1 %636  ;;  %v1628_v11 = vld [vmem:[#allocation3] sm:$0xff] }
 0x25f   : > { %v1631_v12 = vsel %vm339_vm0, %v635_v8, %v637_v10  ;;  %722 = vrot.lane.b32.xlu0 %v1628_v11, %s1438_s25 }
 0x260   : > { %v639_v13 = vpop.permute.xlu0 %638 }
 0x261   : > { %v1636_v14 = vsel %vm339_vm0, %v637_v10, %v639_v13  ;;  %665 = vst.msk [vmem:[#allocation3 + $0x48] sm:$0xff] %vm339_vm0, %v639_v13 }
 0x262   : > { %v629_v15 = vpop.permute.xlu1 %628  ;;  %v1661_v21 = vld [vmem:[#allocation3 + $0x28] sm:$0xff] }
 0x263   : > { %v1640_v16 = vsel %vm339_vm0, %v627_v5, %v629_v15  ;;  %724 = vrot.lane.b32.xlu0 %v1622_v6, %s1438_s25 }
 0x264   : > { %v631_v17 = vpop.permute.xlu0 %630 }
 0x265   : > { %v1645_v18 = vsel %vm339_vm0, %v629_v15, %v631_v17  ;;  %660 = vst.msk [vmem:[#allocation3 + $0x20] sm:$0xff] %vm339_vm0, %v631_v17 }
 0x267   : > { %728 = vrot.lane.b32.xlu0 %v1645_v18, %s1438_s25 }
 0x268   : > { %v675_v20 = vld [vmem:[#allocation3 + $0x48] sm:$0xff] }
 0x26b   : > { %688 = vrot.lane.b32.xlu0 %v1622_v6, %s1439_s26 }
 0x26c   : > { %v670_v19 = vld [vmem:[#allocation3 + $0x20] sm:$0xff] }
 0x26d   : > { %730 = vrot.lane.b32.xlu1 %v670_v19, %s1438_s25 }
 0x26f   : > { %692 = vrot.lane.b32.xlu0 %v1645_v18, %s1439_s26 }
 0x271   : > { %726 = vrot.lane.b32.xlu1 %v1640_v16, %s1438_s25 }
 0x273   : > { %740 = vrot.lane.b32.xlu0 %v675_v20, %s1438_s25 }
 0x275   : > { %690 = vrot.lane.b32.xlu1 %v1640_v16, %s1439_s26 }
 0x277   : > { %704 = vrot.lane.b32.xlu0 %v675_v20, %s1439_s26 }
 0x279   : > { %732 = vrot.lane.b32.xlu1 %v1661_v21, %s1438_s25 }
 0x27b   : > { %736 = vrot.lane.b32.xlu0 %v1631_v12, %s1438_s25 }
 0x27d   : > { %696 = vrot.lane.b32.xlu1 %v1661_v21, %s1439_s26 }
 0x27f   : > { %700 = vrot.lane.b32.xlu0 %v1631_v12, %s1439_s26 }
 0x281   : > { %734 = vrot.lane.b32.xlu1 %v1626_v9, %s1438_s25 }
 0x283   : > { %686 = vrot.lane.b32.xlu0 %v1628_v11, %s1439_s26 }
 0x285   : > { %738 = vrot.lane.b32.xlu1 %v1636_v14, %s1438_s25  ;;  %s1362_s25 = sshll.u32 %s1441_s16, 4  ;;  %s1363_s25 = int_to_ptr.vmem [resolvable:$false] %s1362_s25 }
 0x286   : > { %s1364_s19 = scalar_lea.vmem %s1363_s25, 2048 }
 0x287   : > { %769 = vperm.xlu0 %1356, %v761_v22  }
 0x289   : > { %698 = vrot.lane.b32.xlu1 %v1626_v9, %s1439_s26 }
 0x28b   : > { %1117 = vperm.xlu0 %1356, %v1109_v23  }
 0x28d   : > { %702 = vrot.lane.b32.xlu1 %v1636_v14, %s1439_s26 }
 0x28f   : > { %1145 = vperm.xlu0 %1356, %v1137_v24  }
 0x291   : > { %694 = vrot.lane.b32.xlu1 %v670_v19, %s1439_s26  ;;  %s1188_s26 = sshll.u32 %s1753_s22, 4  ;;  %s1768_s26 = int_to_ptr.vmem [resolvable:$true] %s1188_s26 }
 0x292   : > { %s1358_s30 = scalar_lea.vmem %s1768_s26, 1024  ;;  %p1365_p1 = scmp.lt.s32.totalorder %s1768_s26, %s1363_s25 }
 0x293   : > { %p1359_p12 = scmp.ne.s32.totalorder %s1768_s26, %s1358_s30  ;;  %p1366_p2 = scmp.lt.s32.totalorder %s1364_s19, %s1358_s30 }
 0x295   : > { %764 = vperm.xlu1 %1357, %v760_v25   ;;  %p1360_p13 = pnand %p1359_p12, %p1529_p4  ;;  %p1367_p3 = por %p1366_p2, %p1365_p1 }
 0x297   : > { %p1361_p0 = pneg %p1360_p13 }
 0x299   : > { %1112 = vperm.xlu1 %1357, %v1108_v26   ;;  %p1368_p5 = pnand %p1367_p3, %p1361_p0 }
 0x29d   : > { %1140 = vperm.xlu1 %1357, %v1136_v27  }
 0x2d1   : > { %v723_v28 = vpop.permute.xlu0 %722 }
 0x2d5   : > { %v725_v29 = vpop.permute.xlu0 %724 }
 0x2d6   : > { %v742_v46 = vsel %vm424_vm2, %v723_v28, %v725_v29 }
 0x2d9   : > { %v729_v30 = vpop.permute.xlu0 %728 }
 0x2dd   : > { %v689_v31 = vpop.permute.xlu0 %688 }
 0x2df   : > { %v731_v32 = vpop.permute.xlu1 %730 }
 0x2e0   : > { %v745_v50 = vsel %vm424_vm2, %v729_v30, %v731_v32 }
 0x2e1   : > { %v693_v33 = vpop.permute.xlu0 %692 }
 0x2e3   : > { %v727_v34 = vpop.permute.xlu1 %726 }
 0x2e4   : > { %v743_v44 = vsel %vm424_vm2, %v725_v29, %v727_v34  ;;  %v744_v51 = vsel %vm424_vm2, %v727_v34, %v729_v30 }
 0x2e5   : > { %v741_v35 = vpop.permute.xlu0 %740 }
 0x2e7   : > { %v691_v36 = vpop.permute.xlu1 %690 }
 0x2e8   : > { %v707_v56 = vsel %vm405_vm3, %v689_v31, %v691_v36  ;;  %v708_v5 = vsel %vm405_vm3, %v691_v36, %v693_v33 }
 0x2e9   : > { %v705_v37 = vpop.permute.xlu0 %704 }
 0x2eb   : > { %v733_v38 = vpop.permute.xlu1 %732 }
 0x2ed   : > { %v737_v40 = vpop.permute.xlu0 %736 }
 0x2ef   : > { %v697_v39 = vpop.permute.xlu1 %696 }
 0x2f1   : > { %v701_v45 = vpop.permute.xlu0 %700 }
 0x2f3   : > { %v735_v41 = vpop.permute.xlu1 %734 }
 0x2f4   : > { %v746_v42 = vsel %vm424_vm2, %v733_v38, %v735_v41  ;;  %v747_v43 = vsel %vm424_vm2, %v735_v41, %v737_v40 }
 0x2f5   : > { %799 = vmatprep.subr.mxu0 %v747_v43  ;;  %v687_v54 = vpop.permute.xlu0 %686 }
 0x2f6   : > { %800 = vmatpush1.msra.mxu0 %v746_v42  ;;  %v706_v57 = vsel %vm405_vm3, %v687_v54, %v689_v31 }
 0x2f7   : > { %v739_v47 = vpop.permute.xlu1 %738  ;;  %801 = vmatprep.subr.mxu0 %v743_v44 }
 0x2f8   : > { %v748_v48 = vsel %vm424_vm2, %v737_v40, %v739_v47  ;;  %802 = vmatpush1.msra.mxu0 %v742_v46  ;;  %v749_v49 = vsel %vm424_vm2, %v739_v47, %v741_v35 }
 0x2f9   : > { %876 = vmatprep.subr.mxu1 %v749_v49 }
 0x2fa   : > { %877 = vmatpush1.msra.mxu1 %v748_v48 }
 0x2fb   : > { %v699_v52 = vpop.permute.xlu1 %698  ;;  %878 = vmatprep.subr.mxu1 %v745_v50 }
 0x2fc   : > { %v710_v53 = vsel %vm405_vm3, %v697_v39, %v699_v52  ;;  %879 = vmatpush1.msra.mxu1 %v744_v51  ;;  %v711_v55 = vsel %vm405_vm3, %v699_v52, %v701_v45 }
 0x2fd   : > { %803 = vmatprep.subr.mxu0 %v711_v55 }
 0x2fe   : > { %804 = vmatpush1.msra.mxu0 %v710_v53 }
 0x2ff   : > { %v703_v58 = vpop.permute.xlu1 %702  ;;  %805 = vmatprep.subr.mxu0 %v707_v56 }
 0x300   : > { %v712_v59 = vsel %vm405_vm3, %v701_v45, %v703_v58  ;;  %806 = vmatpush1.msra.mxu0 %v706_v57  ;;  %v713_v60 = vsel %vm405_vm3, %v703_v58, %v705_v37 }
 0x301   : > { %807 = vmatprep.subr.mxu0 %v1626_v9  ;;  %880 = vmatprep.subr.mxu1 %v713_v60 }
 0x302   : > { %808 = vmatpush1.msra.mxu0 %v1661_v21  ;;  %881 = vmatpush1.msra.mxu1 %v712_v59  ;;  %v770_v9 = vpop.permute.xlu0 %769 }
 0x303   : > { %v695_v62 = vpop.permute.xlu1 %694  ;;  %809 = vmatprep.subr.mxu0 %v1622_v6  ;;  %v941_v6 = vld [vmem:[%s1824_s5] sm:$0xff] }
 0x304   : > { %810 = vmatpush1.msra.mxu0 %v1628_v11  ;;  %v709_v63 = vsel %vm405_vm3, %v693_v33, %v695_v62 }
 0x305   : > { %1279 = vmatmul.mubr.msk.f32.vlgmr.msra.gmra.mxu0 %vm772_vm5, %v758_v61  ;;  %882 = vmatprep.subr.mxu1 %v709_v63 }
 0x306   : > { %883 = vmatpush1.msra.mxu1 %v708_v5  ;;  %849 = vmatprep.mubr.f32.mxu0 %v1436_v0  ;;  %v1118_v24 = vpop.permute.xlu0 %1117 }
 0x307   : > { %884 = vmatprep.subr.mxu1 %v1636_v14  ;;  %984 = vmatprep.subr.mxu0 %v1567_v4 }
 0x308   : > { %885 = vmatpush1.msra.mxu1 %v1631_v12  ;;  %985 = vmatpush1.msra.mxu0 %v1559_v2  ;;  %v942_v2 = vld [vmem:[%s1824_s5 + $0x8] sm:$0xff] }
 0x309   : > { %1280 = vmatmul.mubr.msk.f32.gmra.mxu0 %vm772_vm5, %v759_v7  ;;  %886 = vmatprep.subr.mxu1 %v1645_v18 }
 0x30a   : > { %887 = vmatpush1.msra.mxu1 %v1640_v16  ;;  %1018 = vmatprep.mubr.f32.mxu0 %v1436_v0  ;;  %v1146_v49 = vpop.permute.xlu0 %1145 }
 0x30b   : > { %1281 = vmatmul.mubr.msk.f32.vlgmr.msra.gmra.mxu1 %vm772_vm5, %v758_v61  ;;  %1061 = vmatprep.subr.mxu1 %v1565_v3 }
 0x30c   : > { %1062 = vmatpush1.msra.mxu1 %v1557_v1  ;;  %926 = vmatprep.mubr.f32.mxu1 %v1436_v0 }
 0x30d   : > { %1283 = vmatmul.mubr.msk.f32.vlgmr.msra.gmra.mxu0 %vm947_vm6, %v941_v6 }
 0x30e   : > { %1024 = vmatprep.mubr.f32.mxu0 %v1436_v0 }
 0x30f   : > { %1282 = vmatmul.mubr.msk.f32.gmra.mxu1 %vm772_vm5, %v759_v7 }
 0x310   : > { %1095 = vmatprep.mubr.f32.mxu1 %v1436_v0  ;;  %v765_v1 = vpop.permute.xlu1 %764 }
 0x311   : > { %1284 = vmatmul.mubr.msk.f32.gmra.mxu0 %vm947_vm6, %v942_v2 }
 0x313   : > { %1285 = vmatmul.mubr.msk.f32.vlgmr.msra.gmra.mxu1 %vm947_vm6, %v941_v6 }
 0x314   : > { %1101 = vmatprep.mubr.f32.mxu1 %v1436_v0  ;;  %v1113_v10 = vpop.permute.xlu1 %1112 }
 0x317   : > { %1286 = vmatmul.mubr.msk.f32.gmra.mxu1 %vm947_vm6, %v942_v2 }
 0x318   : > { %v1141_v25 = vpop.permute.xlu1 %1140 }
 0x3c5   : > { %v845_v3 = vpop.f32.mrf.mxu0 }
 0x3c6   : > { %v846_v4 = vadd.f32 %v845_v3, %v765_v1 }
 0x3c7   : > { %v847_v8 = vpop.f32.mrf.mxu0 }
 0x3c8   : > { %v933_v11 = vmax.f32 %v846_v4, 0.0  ;;  %v848_v12 = vadd.f32 %v847_v8, %v765_v1 }
 0x3c9   : > { %v851_v13 = vpop.f32.mrf.mxu0 }
 0x3ca   : > { %v934_v14 = vmax.f32 %v848_v12, 0.0  ;;  %v852_v15 = vadd.f32 %v851_v13, %v770_v9  ;;  %v1120_v20 = vmul.f32 %v1113_v10, %v933_v11 }
 0x3cb   : > { %v853_v16 = vpop.f32.mrf.mxu0  ;;  %v922_v17 = vpop.f32.mrf.mxu1 }
 0x3cc   : > { %v854_v18 = vadd.f32 %v853_v16, %v770_v9  ;;  %v923_v19 = vadd.f32 %v922_v17, %v765_v1  ;;  %v937_v0 = vmax.f32 %v852_v15, 0.0  ;;  %v1121_v23 = vmul.f32 %v1113_v10, %v934_v14 }
 0x3cd   : > { %v924_v21 = vpop.f32.mrf.mxu1  ;;  %v1020_v22 = vpop.f32.mrf.mxu0 }
 0x3ce   : > { %v938_v26 = vmax.f32 %v854_v18, 0.0  ;;  %v935_v27 = vmax.f32 %v923_v19, 0.0  ;;  %v925_v28 = vadd.f32 %v924_v21, %v765_v1  ;;  %v1128_v29 = vadd.f32 %v1120_v20, %v1020_v22 }
 0x3cf   : > { %v928_v30 = vpop.f32.mrf.mxu1  ;;  %v1022_v31 = vpop.f32.mrf.mxu0  ;;  %v1124_v38 = vmul.f32 %v1118_v24, %v937_v0 }
 0x3d0   : > { %v936_v32 = vmax.f32 %v925_v28, 0.0  ;;  %v1148_v33 = vadd.f32 %v1141_v25, %v1128_v29  ;;  %v929_v34 = vadd.f32 %v928_v30, %v770_v9  ;;  %v1129_v35 = vadd.f32 %v1121_v23, %v1022_v31 }
 0x3d1   : > { %v930_v36 = vpop.f32.mrf.mxu1  ;;  %v1026_v37 = vpop.f32.mrf.mxu0  ;;  %v1125_v39 = vmul.f32 %v1118_v24, %v938_v26  ;;  %v1122_v40 = vmul.f32 %v1113_v10, %v935_v27 }
 0x3d2   : > { %v1156_v41 = vmax.f32 %v1148_v33, 0.0  ;;  %v939_v42 = vmax.f32 %v929_v34, 0.0  ;;  %v1149_v43 = vadd.f32 %v1141_v25, %v1129_v35  ;;  %v931_v44 = vadd.f32 %v930_v36, %v770_v9 }
 0x3d3   : > { %v1132_v45 = vadd.f32 %v1124_v38, %v1026_v37  ;;  %v1028_v46 = vpop.f32.mrf.mxu0  ;;  %v1097_v47 = vpop.f32.mrf.mxu1  ;;  %v1123_v48 = vmul.f32 %v1113_v10, %v936_v32 }
 0x3d4   : > { %1164 = vst [vmem:[%s1753_s22] sm:$0xff] %v1156_v41  ;;  %v1157_v50 = vmax.f32 %v1149_v43, 0.0  ;;  %v940_v51 = vmax.f32 %v931_v44, 0.0  ;;  %v1133_v52 = vadd.f32 %v1125_v39, %v1028_v46  ;;  %v1130_v53 = vadd.f32 %v1122_v40, %v1097_v47 }
 0x3d5   : > { %v1152_v54 = vadd.f32 %v1146_v49, %v1132_v45  ;;  %v1099_v55 = vpop.f32.mrf.mxu1  ;;  %v1126_v59 = vmul.f32 %v1118_v24, %v939_v42 }
 0x3d6   : > { %1165 = vst [vmem:[%s1753_s22 + $0x8] sm:$0xff] %v1157_v50  ;;  %v1153_v56 = vadd.f32 %v1146_v49, %v1133_v52  ;;  %v1150_v57 = vadd.f32 %v1141_v25, %v1130_v53  ;;  %v1131_v58 = vadd.f32 %v1123_v48, %v1099_v55  ;;  %v1127_v62 = vmul.f32 %v1118_v24, %v940_v51 }
 0x3d7   : > { %v1160_v60 = vmax.f32 %v1152_v54, 0.0  ;;  %v1103_v61 = vpop.f32.mrf.mxu1 }
 0x3d8   : > { %v1161_v63 = vmax.f32 %v1153_v56, 0.0  ;;  %v1158_v5 = vmax.f32 %v1150_v57, 0.0  ;;  %v1151_v7 = vadd.f32 %v1141_v25, %v1131_v58  ;;  %v1134_v6 = vadd.f32 %v1126_v59, %v1103_v61 }
 0x3d9   : > { %1168 = vst [vmem:[%s1753_s22 + $0x20] sm:$0xff] %v1160_v60  ;;  %v1105_v2 = vpop.f32.mrf.mxu1 }
 0x3da   : > { %1169 = vst [vmem:[%s1753_s22 + $0x28] sm:$0xff] %v1161_v63  ;;  %1166 = vst [vmem:[%s1753_s22 + $0x10] sm:$0xff] %v1158_v5  ;;  %v1159_v1 = vmax.f32 %v1151_v7, 0.0  ;;  %v1154_v3 = vadd.f32 %v1146_v49, %v1134_v6  ;;  %v1135_v4 = vadd.f32 %v1127_v62, %v1105_v2 }
 0x3dc   : > { %1167 = vst [vmem:[%s1753_s22 + $0x18] sm:$0xff] %v1159_v1  ;;  %v1162_v8 = vmax.f32 %v1154_v3, 0.0  ;;  %v1155_v9 = vadd.f32 %v1146_v49, %v1135_v4 }
 0x3de   : > { %1170 = vst [vmem:[%s1753_s22 + $0x30] sm:$0xff] %v1162_v8  ;;  %v1163_v10 = vmax.f32 %v1155_v9, 0.0 }
 0x3e0   : > { %1171 = vst [vmem:[%s1753_s22 + $0x38] sm:$0xff] %v1163_v10 }
 0x3e1   : > { %1371 = shalt.err (!%p1368_p5)
}
 0x3e2   : > { %s1372_s20 = scalar_lea.hbm %s1766_s12, 1024  ;;  %s1376_s23 = scalar_lea.hbm %s1827_s8, 2048 }
 0x3e3   : > { %p1373_p6 = scmp.ne.s32.totalorder %s1766_s12, %s1372_s20  ;;  %p1377_p10 = scmp.lt.s32.totalorder %s1766_s12, %s1827_s8 }
 0x3e4   : > { %p1378_p11 = scmp.lt.s32.totalorder %s1376_s23, %s1372_s20 }
 0x3e5   : > { %p1374_p7 = pnand %p1373_p6, %p1529_p4 }
 0x3e6   : > { %p1379_p12 = por %p1378_p11, %p1377_p10 }
 0x3e7   : > { %p1375_p9 = pneg %p1374_p7 }
 0x3e9   : > { %p1380_p13 = pnand %p1379_p12, %p1375_p9 }
 0x3eb   : > { %1383 = shalt.err (!%p1380_p13)
}
 0x3ec   : > { %s1442_s30 = smov 512   ;;  %s1443_s16 = smov 32  }
 0x3ed   : > { %1294 = dma.vmem_to_hbm [thread:$0]  (%p1529_p4), %s1768_s26, 1024, %s1766_s12, %s1774_s14, %s1442_s30, %s1442_s30, %s1443_s16  }
 0x3ee PF: > { %p1300_p0 = scmp.ge.s32.totalorder %s1434_s10, 2  ;;  %s1203_s25 = sand.u32 1, %s1414_s27  }
 0x3ef   : > { %s1204_s19 = scalar_lea.sflag [#allocation5], %s1203_s25 }
 0x3f0   : > { %p1297_p1 = pnand %p1300_p0, %p1536_p8 }
 0x3f2   : > { %p1298_p2 = pneg %p1297_p1 }
 0x3f4   : > { %1409 = dma.done.wait (%p1298_p2), %s1204_s19, 1024  }
 0x3f5   : > { %1411 = vsyncadd (%p1298_p2), %s1204_s19, 4294966272  ;;  %s21_s10 = sadd.s32 1, %s1434_s10   ;;  %s1830_s27 = smov %s1418_s28 }
 0x3f6   : > { %p18_p3 = scmp.ge.s32.totalorder %s21_s10, 4   ;;  %s1831_s28 = smov %s1422_s29 }
 0x3f7   : > { %s1832_s29 = smov %s1542_s18  ;;  %s1833_s30 = smov %s1430_s9 }
 0x3f8   : > { %s1834_s9 = smov %s1836_s13  ;;  %20 = sbr.rel (!%p18_p3) target bundleno = 4 (0x4), region = 95 }
 0x3fd   :  { %1209 = vsyncpa [#allocation5], 1 }
 0x3fe   :  { %1211 = vsyncpa [#allocation5 + $0x1], 1 }

</bundles_post_ra>
